<compile_context>
chip_gen: v5e
topology: v5e:2x2
jax: 0.10.0
libtpu: 0.0.40
codegen_flags: <defaults>
</compile_context>

<pallas_src>
import jax
import jax.numpy as jnp
from jax.experimental import pallas as pl
from jax.experimental.pallas import tpu as pltpu


_TARGET_TOKENS_PER_STEP = 128            # review: 128-256; 128 also suits v5e
_VMEM_TABLE_BYTES_CAP = 4 * 1024 * 1024  # small-table fast path (v7x-safe)
_MAX_OUT_BLOCK_BYTES = 8 * 1024 * 1024   # per output buffer (x2 when pipelined)


def _round_up(x, m):
    return ((x + m - 1) // m) * m


def _choose_tokens_per_step(n_tok, d_model, itemsize):
    """Embedding rows gathered per grid step."""
    sub = max(8, 32 // max(1, itemsize))          # packed-sublane multiple
    n_min = _round_up(max(n_tok, 1), sub)
    t = min(_round_up(_TARGET_TOKENS_PER_STEP, sub), n_min)
    # Keep the (double-buffered) output block modest for every generation.
    rows_cap = max(sub,
                   (_MAX_OUT_BLOCK_BYTES // max(1, d_model * itemsize)) // sub * sub)
    t = min(t, rows_cap)
    # Prefer >= 2 grid steps so both v7x TensorCores get grid work.
    if sub < n_min <= t:
        half = _round_up((n_min + 1) // 2, sub)
        t = max(sub, min(t, half))
    return t


# --------------------------------------------------------------------------
# Kernels
# --------------------------------------------------------------------------
def _embed_vmem_kernel(tok_ref, w_ref, out_ref):
    """Small-table path: gather rows of a VMEM-resident table.

    tok_ref: SMEM (n_pad,) int32        -- scalar-prefetched flattened ids
    w_ref:   VMEM (d_vocab, d_model)    -- whole embedding table
    out_ref: VMEM (t_step, d_model)     -- output tile for this grid step
    """
    t_rows = out_ref.shape[0]
    base = pl.multiple_of(pl.program_id(0) * t_rows, t_rows)

    def body(t, carry):
        row = tok_ref[base + t]
        out_ref[pl.ds(t, 1), :] = w_ref[pl.ds(row, 1), :]
        return carry

    jax.lax.fori_loop(0, t_rows, body, 0, unroll=8)


def _embed_hbm_kernel(tok_ref, w_hbm, out_ref, sem):
    """Large-table path: per-row HBM DMAs straight into the output block.

    tok_ref: SMEM (n_pad,) int32        -- scalar-prefetched flattened ids
    w_hbm:   ANY  (d_vocab, d_model)    -- embedding table, left in HBM
    out_ref: VMEM (t_step, d_model)     -- output tile (DMA destination)
    sem:     single shared DMA semaphore
    """
    t_rows = out_ref.shape[0]
    base = pl.multiple_of(pl.program_id(0) * t_rows, t_rows)

    # Start every row DMA first: all SMEM token reads happen before any wait,
    # avoiding the SMEM store->load forwarding stall a DMA wait introduces.
    def start(t, carry):
        row = tok_ref[base + t]
        pltpu.make_async_copy(
            w_hbm.at[pl.ds(row, 1), :],
            out_ref.at[pl.ds(t, 1), :],
            sem,
        ).start()
        return carry

    jax.lax.fori_loop(0, t_rows, start, 0, unroll=8)

    # Then wait for all of them.  Every copy has the identical (1, d_model)
    # shape, so t_rows equal-sized waits on the shared semaphore balance the
    # starts exactly.
    def wait(t, carry):
        pltpu.make_async_copy(
            w_hbm.at[pl.ds(0, 1), :],
            out_ref.at[pl.ds(t, 1), :],
            sem,
        ).wait()
        return carry

    jax.lax.fori_loop(0, t_rows, wait, 0, unroll=8)


# --------------------------------------------------------------------------
# Wrapper
# --------------------------------------------------------------------------
def embed_forward(W_E, tokens, *, force_hbm_gather=False):
    """out[b, p, :] = W_E[tokens[b, p], :]  -- shape (batch, pos, d_model)."""
    batch, pos = tokens.shape
    d_vocab, d_model = W_E.shape
    itemsize = jnp.dtype(W_E.dtype).itemsize

    n_tok = batch * pos
    t_step = _choose_tokens_per_step(n_tok, d_model, itemsize)
    n_pad = _round_up(n_tok, t_step)
    grid = (n_pad // t_step,)

    # Clamp ids so an out-of-range token cannot become an out-of-bounds HBM
    # DMA (which would hard-fault rather than raise cleanly).
    tok_flat = jnp.clip(tokens.reshape(n_tok).astype(jnp.int32), 0, d_vocab - 1)
    if n_pad != n_tok:
        # Pad with row 0 (always exists); padded rows are sliced off below.
        tok_flat = jnp.concatenate(
            [tok_flat, jnp.zeros((n_pad - n_tok,), jnp.int32)])

    out_spec = pl.BlockSpec((t_step, d_model), lambda i, tok: (i, 0))
    out_shape = jax.ShapeDtypeStruct((n_pad, d_model), W_E.dtype)

    table_bytes = d_vocab * d_model * itemsize
    use_vmem_table = (not force_hbm_gather) and table_bytes <= _VMEM_TABLE_BYTES_CAP

    if use_vmem_table:
        # Small-table fast path: table resident in VMEM, gather = vector loads.
        grid_spec = pltpu.PrefetchScalarGridSpec(
            num_scalar_prefetch=1,                          # tok_flat -> SMEM
            grid=grid,
            in_specs=[pl.BlockSpec((d_vocab, d_model), lambda i, tok: (0, 0))],
            out_specs=out_spec,
        )
        kernel = _embed_vmem_kernel
        vmem_need = 2 * table_bytes + 2 * t_step * d_model * itemsize
    else:
        # Large-table path: W_E stays in HBM, rows DMA'd straight into out_ref.
        grid_spec = pltpu.PrefetchScalarGridSpec(
            num_scalar_prefetch=1,                          # tok_flat -> SMEM
            grid=grid,
            in_specs=[pl.BlockSpec(memory_space=pl.ANY)],   # W_E left in HBM
            out_specs=out_spec,
            scratch_shapes=[pltpu.SemaphoreType.DMA],       # one shared sem
        )
        kernel = _embed_hbm_kernel
        vmem_need = 2 * t_step * d_model * itemsize

    # Only raise the scoped-VMEM limit when the estimate actually needs it
    # (defaults: 16 MiB v5e, 32 MiB v6e/v7x).
    compiler_kwargs = dict(dimension_semantics=("parallel",))
    if vmem_need > 12 * 1024 * 1024:
        compiler_kwargs["vmem_limit_bytes"] = int(
            min(2 * vmem_need, 48 * 1024 * 1024))

    out = pl.pallas_call(
        kernel,
        out_shape=out_shape,
        grid_spec=grid_spec,
        compiler_params=pltpu.CompilerParams(**compiler_kwargs),
    )(tok_flat, W_E)

    return out[:n_tok].reshape(batch, pos, d_model)


# --------------------------------------------------------------------------
# Pure-JAX reference (mirror of the PyTorch forward: W_E[tokens, :])
# --------------------------------------------------------------------------
def _ref_forward(W_E, tokens):
    return jnp.take(W_E, tokens, axis=0)


# --------------------------------------------------------------------------
# Main
# --------------------------------------------------------------------------
if __name__ == "__main__":
    key = jax.random.PRNGKey(0)
    kw, kt, kt2 = jax.random.split(key, 3)

    batch, pos, d_vocab, d_model = 2, 8, 64, 128
    W_E = jax.random.normal(kw, (d_vocab, d_model), dtype=jnp.float32)
    tokens = jax.random.randint(kt, (batch, pos), 0, d_vocab, dtype=jnp.int32)
    ref = _ref_forward(W_E, tokens)

    # Small-table fast path (VMEM-resident table).
    out = jax.block_until_ready(embed_forward(W_E, tokens))
    assert out.shape == (batch, pos, d_model)
    assert jnp.array_equal(out, ref), "embed gather mismatch (vmem path)"

    # Large-table path exercised on the same data (HBM row DMAs into out_ref).
    out_hbm = jax.block_until_ready(
        embed_forward(W_E, tokens, force_hbm_gather=True))
    assert jnp.array_equal(out_hbm, ref), "embed gather mismatch (hbm path)"

    # Non-multiple-of-tile token count (exercises the padding path).
    tokens2 = jax.random.randint(kt2, (3, 5), 0, d_vocab, dtype=jnp.int32)
    out2 = jax.block_until_ready(embed_forward(W_E, tokens2))
    ref2 = _ref_forward(W_E, tokens2)
    assert out2.shape == (3, 5, d_model)
    assert jnp.array_equal(out2, ref2), "embed gather mismatch (padded)"

    print("KERNEL_OK")
</pallas_src>

<mosaic_0001>
module attributes {stable_mosaic.version = 11 : i64} {
  func.func @_embed_vmem_kernel(%arg0: i32, %arg1: memref<16xi32, #tpu.memory_space<smem>>, %arg2: memref<64x128xf32, #tpu.memory_space<vmem>>, %arg3: memref<8x128xf32, #tpu.memory_space<vmem>>) attributes {dimension_semantics = [#tpu.dimension_semantics<parallel>], iteration_bounds = array<i64: 2>, scalar_prefetch = 1 : i64, scratch_operands = 0 : i64, tpu.core_type = #tpu.core_type<tc>, window_params = [{pipeline_mode = #tpu.pipeline_mode<synchronous>, transform_indices = @transform_0, window_bounds = array<i64: 64, 128>}, {transform_indices = @transform_1, window_bounds = array<i64: 8, 128>}]} {
    %c8_i32 = arith.constant 8 : i32
    %0 = arith.muli %arg0, %c8_i32 : i32
    %1 = tpu.assume_multiple %0, 8 : i32
    %c0_i32 = arith.constant 0 : i32
    %2 = arith.addi %1, %c0_i32 : i32
    %3 = arith.index_cast %2 : i32 to index
    %4 = memref.load %arg1[%3] : memref<16xi32, #tpu.memory_space<smem>>
    %5 = arith.index_cast %4 : i32 to index
    %c0 = arith.constant 0 : index
    %6 = vector.load %arg2[%5, %c0] : memref<64x128xf32, #tpu.memory_space<vmem>>, vector<1x128xf32>
    %7 = arith.index_cast %c0_i32 : i32 to index
    %c0_0 = arith.constant 0 : index
    %8 = vector.load %arg3[%7, %c0_0] : memref<8x128xf32, #tpu.memory_space<vmem>>, vector<1x128xf32>
    tpu.vector_store %arg3[%7, %c0_0], %6 {strides = array<i32>} : memref<8x128xf32, #tpu.memory_space<vmem>>, vector<1x128xf32>,
    %c1_i32 = arith.constant 1 : i32
    %9 = arith.addi %1, %c1_i32 : i32
    %10 = arith.index_cast %9 : i32 to index
    %11 = memref.load %arg1[%10] : memref<16xi32, #tpu.memory_space<smem>>
    %12 = arith.index_cast %11 : i32 to index
    %c0_1 = arith.constant 0 : index
    %13 = vector.load %arg2[%12, %c0_1] : memref<64x128xf32, #tpu.memory_space<vmem>>, vector<1x128xf32>
    %14 = arith.index_cast %c1_i32 : i32 to index
    %c0_2 = arith.constant 0 : index
    %15 = vector.load %arg3[%14, %c0_2] : memref<8x128xf32, #tpu.memory_space<vmem>>, vector<1x128xf32>
    tpu.vector_store %arg3[%14, %c0_2], %13 {strides = array<i32>} : memref<8x128xf32, #tpu.memory_space<vmem>>, vector<1x128xf32>,
    %c2_i32 = arith.constant 2 : i32
    %16 = arith.addi %1, %c2_i32 : i32
    %17 = arith.index_cast %16 : i32 to index
    %18 = memref.load %arg1[%17] : memref<16xi32, #tpu.memory_space<smem>>
    %19 = arith.index_cast %18 : i32 to index
    %c0_3 = arith.constant 0 : index
    %20 = vector.load %arg2[%19, %c0_3] : memref<64x128xf32, #tpu.memory_space<vmem>>, vector<1x128xf32>
    %21 = arith.index_cast %c2_i32 : i32 to index
    %c0_4 = arith.constant 0 : index
    %22 = vector.load %arg3[%21, %c0_4] : memref<8x128xf32, #tpu.memory_space<vmem>>, vector<1x128xf32>
    tpu.vector_store %arg3[%21, %c0_4], %20 {strides = array<i32>} : memref<8x128xf32, #tpu.memory_space<vmem>>, vector<1x128xf32>,
    %c3_i32 = arith.constant 3 : i32
    %23 = arith.addi %1, %c3_i32 : i32
    %24 = arith.index_cast %23 : i32 to index
    %25 = memref.load %arg1[%24] : memref<16xi32, #tpu.memory_space<smem>>
    %26 = arith.index_cast %25 : i32 to index
    %c0_5 = arith.constant 0 : index
    %27 = vector.load %arg2[%26, %c0_5] : memref<64x128xf32, #tpu.memory_space<vmem>>, vector<1x128xf32>
    %28 = arith.index_cast %c3_i32 : i32 to index
    %c0_6 = arith.constant 0 : index
    %29 = vector.load %arg3[%28, %c0_6] : memref<8x128xf32, #tpu.memory_space<vmem>>, vector<1x128xf32>
    tpu.vector_store %arg3[%28, %c0_6], %27 {strides = array<i32>} : memref<8x128xf32, #tpu.memory_space<vmem>>, vector<1x128xf32>,
    %c4_i32 = arith.constant 4 : i32
    %30 = arith.addi %1, %c4_i32 : i32
    %31 = arith.index_cast %30 : i32 to index
    %32 = memref.load %arg1[%31] : memref<16xi32, #tpu.memory_space<smem>>
    %33 = arith.index_cast %32 : i32 to index
    %c0_7 = arith.constant 0 : index
    %34 = vector.load %arg2[%33, %c0_7] : memref<64x128xf32, #tpu.memory_space<vmem>>, vector<1x128xf32>
    %35 = arith.index_cast %c4_i32 : i32 to index
    %c0_8 = arith.constant 0 : index
    %36 = vector.load %arg3[%35, %c0_8] : memref<8x128xf32, #tpu.memory_space<vmem>>, vector<1x128xf32>
    tpu.vector_store %arg3[%35, %c0_8], %34 {strides = array<i32>} : memref<8x128xf32, #tpu.memory_space<vmem>>, vector<1x128xf32>,
    %c5_i32 = arith.constant 5 : i32
    %37 = arith.addi %1, %c5_i32 : i32
    %38 = arith.index_cast %37 : i32 to index
    %39 = memref.load %arg1[%38] : memref<16xi32, #tpu.memory_space<smem>>
    %40 = arith.index_cast %39 : i32 to index
    %c0_9 = arith.constant 0 : index
    %41 = vector.load %arg2[%40, %c0_9] : memref<64x128xf32, #tpu.memory_space<vmem>>, vector<1x128xf32>
    %42 = arith.index_cast %c5_i32 : i32 to index
    %c0_10 = arith.constant 0 : index
    %43 = vector.load %arg3[%42, %c0_10] : memref<8x128xf32, #tpu.memory_space<vmem>>, vector<1x128xf32>
    tpu.vector_store %arg3[%42, %c0_10], %41 {strides = array<i32>} : memref<8x128xf32, #tpu.memory_space<vmem>>, vector<1x128xf32>,
    %c6_i32 = arith.constant 6 : i32
    %44 = arith.addi %1, %c6_i32 : i32
    %45 = arith.index_cast %44 : i32 to index
    %46 = memref.load %arg1[%45] : memref<16xi32, #tpu.memory_space<smem>>
    %47 = arith.index_cast %46 : i32 to index
    %c0_11 = arith.constant 0 : index
    %48 = vector.load %arg2[%47, %c0_11] : memref<64x128xf32, #tpu.memory_space<vmem>>, vector<1x128xf32>
    %49 = arith.index_cast %c6_i32 : i32 to index
    %c0_12 = arith.constant 0 : index
    %50 = vector.load %arg3[%49, %c0_12] : memref<8x128xf32, #tpu.memory_space<vmem>>, vector<1x128xf32>
    tpu.vector_store %arg3[%49, %c0_12], %48 {strides = array<i32>} : memref<8x128xf32, #tpu.memory_space<vmem>>, vector<1x128xf32>,
    %c7_i32 = arith.constant 7 : i32
    %51 = arith.addi %1, %c7_i32 : i32
    %52 = arith.index_cast %51 : i32 to index
    %53 = memref.load %arg1[%52] : memref<16xi32, #tpu.memory_space<smem>>
    %54 = arith.index_cast %53 : i32 to index
    %c0_13 = arith.constant 0 : index
    %55 = vector.load %arg2[%54, %c0_13] : memref<64x128xf32, #tpu.memory_space<vmem>>, vector<1x128xf32>
    %56 = arith.index_cast %c7_i32 : i32 to index
    %c0_14 = arith.constant 0 : index
    %57 = vector.load %arg3[%56, %c0_14] : memref<8x128xf32, #tpu.memory_space<vmem>>, vector<1x128xf32>
    tpu.vector_store %arg3[%56, %c0_14], %55 {strides = array<i32>} : memref<8x128xf32, #tpu.memory_space<vmem>>, vector<1x128xf32>,
    %c8_i32_15 = arith.constant 8 : i32
    return
  }
  func.func @transform_0(%arg0: i32, %arg1: memref<16xi32, #tpu.memory_space<smem>>) -> (i32, i32) {
    %c0_i32 = arith.constant 0 : i32
    %c0_i32_0 = arith.constant 0 : i32
    %c0_i32_1 = arith.constant 0 : i32
    return %c0_i32, %c0_i32_0 : i32, i32
  }
  func.func @transform_1(%arg0: i32, %arg1: memref<16xi32, #tpu.memory_space<smem>>) -> (i32, i32) {
    %c0_i32 = arith.constant 0 : i32
    %c0_i32_0 = arith.constant 0 : i32
    return %arg0, %c0_i32 : i32, i32
  }
}

</mosaic_0001>

<bundles_post_ra>
// kernel: tpu_custom_call.1
= control target key start
LH: loop header
LB: loop body
LE: loop exit
PB: predicated region body
PF: predicated region fallthrough
CT: control target
= control target key end

     0   :  { %s420_s12 = smov [#allocation3]   ;;  %s558_s0 = inlined_call_operand.hbm [shape: s32[16], index: 0, kind: input, shape index: {}]   ;;  %s559_s1 = inlined_call_operand.hbm [shape: f32[64,128], index: 1, kind: input, shape index: {}]   ;;  %s560_s2 = inlined_call_operand.hbm [shape: f32[16,128], index: 2, kind: output, shape index: {}]  }
   0x1   :  { %s8_s11 = sshll.u32 %s558_s0, 4  ;;  %s9_s11 = int_to_ptr.hbm [resolvable:$true] %s8_s11 }
   0x2   :  { %11 = dma.hbm_to_smem %s9_s11, 16, %s420_s12, [#allocation2] }
   0x3   :  { %394 = dma.done.wait [#allocation2], 16 }
   0x4   :  { %395 = vsyncadd [#allocation2], 4294967280 }
   0x5   :  { %14 = sfence }
   0x6   :  { %15 = vsyncpa [#allocation5], 0 }
   0x7   :  { %16 = vsyncpa [#allocation6], 0 }
   0x8   :  { %18 = vsyncpa [#allocation6 + $0x1], 0  ;;  %s442_s13 = smov 0   ;;  %s444_s14 = smov 0  }
   0x9   :  { %s446_s15 = smov 0   ;;  %s448_s16 = smov 0  }
   0xa LB: > { %s463_s0 = sadd.s32 4294967295, %s418_s16   ;;  %s244_s17 = sadd.s32 4294967294, %s418_s16   ;;  %s418_s16 = sphi %s448_s16, %s566_s16   ;;  %s414_s15 = sphi %s446_s15, %s565_s15   ;;  %s410_s14 = sphi %s444_s14, %s564_s14   ;;  %s406_s13 = sphi %s442_s13, %s563_s13  }
   0xb   : > { %s467_s18 = sadd.s32 1, %s418_s16   ;;  %s52_s19 = sadd.s32 1, %s414_s15 }
   0xc   : > { %s49_s20 = ssub.s32 %s418_s16, %s467_s18  ;;  %p62_p0 = scmp.ne.s32.totalorder %s414_s15, %s410_s14 }
   0xd   : > { %p50_p1 = scmp.eq.s32.totalorder %s49_s20, 0  ;;  %p63_p2 = scmp.eq.s32.totalorder %s463_s0, 1 }
   0xe   : > { %p68_p3 = scmp.ne.s32.totalorder %s410_s14, %s406_s13  ;;  %p69_p4 = scmp.eq.s32.totalorder %s244_s17, 1 }
   0xf   : > { %s478_s21 = scalar_select %p50_p1, %s414_s15, %s52_s19  }
  0x10   : > { %p480_p5 = por %p63_p2, %p62_p0  ;;  %p484_p6 = por %p69_p4, %p68_p3 }
  0x11   : > { %p245_p7 = scmp.ge.s32.totalorder %s418_s16, 1  ;;  %p76_p8 = scmp.lt.s32.totalorder %s418_s16, 3 }
  0x12   : > { %p269_p9 = scmp.eq.s32.totalorder %s463_s0, 0  ;;  %s87_s26 = sshll.u32 %s559_s1, 4  ;;  %s88_s26 = int_to_ptr.hbm [resolvable:$true] %s87_s26 }
  0x13   : > { %p77_p10 = pnand %p245_p7, %p76_p8  ;;  %s421_s27 = smov [#allocation4]  }
  0x14   : > { %s89_s28 = sshll.u32 %s421_s27, 4  ;;  %s422_s29 = smov 128   ;;  %s90_s28 = int_to_ptr.vmem [resolvable:$true] %s89_s28 }
  0x15   : > { %p261_p11 = pneg %p77_p10  ;;  %s423_s30 = smov 8  }
  0x16   : > { %105 = sbr.rel (%p77_p10) target bundleno = 55 (0x37), region = 24 }
  0x17   : > { %p262_p12 = pnand %p269_p9, %p261_p11 }
  0x19   : > { %264 = dma.hbm_to_vmem [thread:$0]  (!%p262_p12), %s88_s26, 1024, %s90_s28, [#allocation5], %s422_s29, %s422_s29, %s423_s30  }
  0x1b   : > { %397 = dma.done.wait (%p269_p9), [#allocation5], 1024  }
  0x1c   : > { %399 = vsyncadd (%p269_p9), [#allocation5], 4294966272  ;;  %s118_s3 = sand.u32 1, %s410_s14   ;;  %s502_s4 = sshll.u32 %s463_s0, 3 }
  0x1d   : > { %s249_s5 = sshll.u32 %s118_s3, 3  ;;  %s122_s6 = sld [smem:[#allocation3 + %s502_s4]] }
  0x1e   : > { %s126_s7 = sadd.s32 1, %s502_s4  ;;  %s131_s8 = sadd.s32 2, %s502_s4 }
  0x1f   : > { %s127_s9 = sld [smem:[#allocation3 + %s126_s7]]  ;;  %s136_s10 = sadd.s32 3, %s502_s4 }
  0x20   : > { %s132_s11 = sld [smem:[#allocation3 + %s131_s8]]  ;;  %s141_s12 = sadd.s32 4, %s502_s4 }
  0x21   : > { %s137_s0 = sld [smem:[#allocation3 + %s136_s10]]  ;;  %s146_s17 = sadd.s32 5, %s502_s4 }
  0x22   : > { %s142_s19 = sld [smem:[#allocation3 + %s141_s12]]  ;;  %s151_s25 = sadd.s32 6, %s502_s4 }
  0x23   : > { %s123_s20 = scalar_lea.vmem [#allocation4], %s122_s6  ;;  %s147_s24 = sld [smem:[#allocation3 + %s146_s17]] }
  0x24   : > { %v124_v0 = vld [vmem:[%s123_s20] sm:$0x1]  ;;  %s513_s26 = scalar_lea.vmem [#allocation7], %s249_s5  ;;  %s152_s27 = sld [smem:[#allocation3 + %s151_s25]] }
  0x25   : > { %125 = vst [vmem:[%s513_s26] sm:$0x1] %v124_v0  ;;  %s156_s28 = sadd.s32 7, %s502_s4  ;;  %s128_s30 = scalar_lea.vmem [#allocation4], %s127_s9 }
  0x26   : > { %s157_s29 = sld [smem:[#allocation3 + %s156_s28]]  ;;  %v129_v1 = vld [vmem:[%s128_s30] sm:$0x1]  ;;  %s172_s6 = scalar_lea.hbm %s560_s2, %s502_s4 }
  0x27   : > { %130 = vst [vmem:[%s513_s26 + $0x1] sm:$0x1] %v129_v1  ;;  %s133_s5 = scalar_lea.vmem [#allocation4], %s132_s11  ;;  %s174_s10 = sshll.u32 %s513_s26, 4  ;;  %s175_s10 = int_to_ptr.vmem [resolvable:$true] %s174_s10 }
  0x28   : > { %v134_v2 = vld [vmem:[%s133_s5] sm:$0x1]  ;;  %s138_s12 = scalar_lea.vmem [#allocation4], %s137_s0  ;;  %s143_s17 = scalar_lea.vmem [#allocation4], %s142_s19 }
  0x29   : > { %135 = vst [vmem:[%s513_s26 + $0x2] sm:$0x1] %v134_v2  ;;  %v139_v3 = vld [vmem:[%s138_s12] sm:$0x1]  ;;  %s176_s9 = sshll.u32 %s172_s6, 4  ;;  %s148_s20 = scalar_lea.vmem [#allocation4], %s147_s24  ;;  %s177_s9 = int_to_ptr.hbm [resolvable:$true] %s176_s9 }
  0x2a   : > { %140 = vst [vmem:[%s513_s26 + $0x3] sm:$0x1] %v139_v3  ;;  %v144_v4 = vld [vmem:[%s143_s17] sm:$0x1]  ;;  %s153_s4 = scalar_lea.vmem [#allocation4], %s152_s27  ;;  %s162_s0 = scalar_lea.sflag [#allocation6], %s118_s3 }
  0x2b   : > { %145 = vst [vmem:[%s513_s26 + $0x4] sm:$0x1] %v144_v4  ;;  %v149_v5 = vld [vmem:[%s148_s20] sm:$0x1]  ;;  %s364_s25 = sshra.s32 %s177_s9, 4  ;;  %s370_s30 = scalar_lea.hbm %s560_s2, 16  ;;  %s365_s25 = int_to_ptr.hbm [resolvable:$true] %s364_s25 }
  0x2c   : > { %150 = vst [vmem:[%s513_s26 + $0x5] sm:$0x1] %v149_v5  ;;  %v154_v6 = vld [vmem:[%s153_s4] sm:$0x1]  ;;  %s158_s11 = scalar_lea.vmem [#allocation4], %s157_s29  ;;  %s366_s19 = scalar_lea.hbm %s365_s25, 8 }
  0x2d   : > { %155 = vst [vmem:[%s513_s26 + $0x6] sm:$0x1] %v154_v6  ;;  %v159_v7 = vld [vmem:[%s158_s11] sm:$0x1]  ;;  %p367_p13 = scmp.ne.s32.totalorder %s365_s25, %s366_s19  ;;  %p371_p2 = scmp.lt.s32.totalorder %s365_s25, %s560_s2 }
  0x2e   : > { %160 = vst [vmem:[%s513_s26 + $0x7] sm:$0x1] %v159_v7  ;;  %p372_p3 = scmp.lt.s32.totalorder %s370_s30, %s366_s19 }
  0x2f   : > { %p368_p0 = pnand %p367_p13, %p480_p5 }
  0x30   : > { %p373_p4 = por %p372_p3, %p371_p2 }
  0x31   : > { %p369_p1 = pneg %p368_p0 }
  0x33   : > { %p374_p7 = pnand %p373_p4, %p369_p1 }
  0x35   : > { %377 = shalt.err (!%p374_p7)
}
  0x36   : > { %259 = dma.vmem_to_hbm [thread:$0]  (%p480_p5), %s175_s10, 128, %s177_s9, %s162_s0  }
  0x37 PF: > { %p271_p8 = scmp.ge.s32.totalorder %s418_s16, 2  ;;  %s188_s3 = sand.u32 1, %s406_s13  }
  0x38   : > { %s189_s26 = scalar_lea.sflag [#allocation6], %s188_s3 }
  0x39   : > { %p266_p9 = pnand %p271_p8, %p484_p6 }
  0x3b   : > { %p267_p10 = pneg %p266_p9 }
  0x3d   : > { %401 = dma.done.wait (%p267_p10), %s189_s26, 128  }
  0x3e   : > { %403 = vsyncadd (%p267_p10), %s189_s26, 4294967168  ;;  %p21_p11 = scmp.ge.s32.totalorder %s467_s18, 4   ;;  %s563_s13 = smov %s410_s14 }
  0x3f   : > { %s564_s14 = smov %s414_s15  ;;  %s565_s15 = smov %s478_s21 }
  0x40   : > { %s566_s16 = smov %s467_s18  ;;  %23 = sbr.rel (!%p21_p11) target bundleno = 10 (0xa), region = 69 }
  0x45   :  { %195 = vsyncpa [#allocation5], 1 }
  0x46   :  { %197 = vsyncpa [#allocation5 + $0x1], 1 }
  0x47   :  { %198 = vsyncpa [#allocation6], 1 }
  0x48   :  { %200 = vsyncpa [#allocation6 + $0x1], 1 }

</bundles_post_ra>
